<compile_context>
chip_gen: v6e
topology: v6e:2x2x1
jax: 0.10.0
libtpu: 0.0.40
codegen_flags: <defaults>
</compile_context>

<pallas_src>
import jax
import jax.numpy as jnp
from jax.experimental import pallas as pl
from jax.experimental.pallas import tpu as pltpu


def _make_kernel(C, C8, N, TI):
    """Kernel closure over the static shape constants."""

    def kernel(gamma_ref, x_ref, wfgh_ref, bfgh_ref, wv_ref, bv_ref,
               o_ref, f_s, g_s, vh_s):
        it = pl.program_id(1)

        # ---- once per batch: fused f/g/h projection + hoisted Wv@h ---------
        @pl.when(it == 0)
        def _setup():
            x = x_ref[0]                                            # (C, N) f32
            proj = jnp.dot(wfgh_ref[...], x,
                           preferred_element_type=jnp.float32) + bfgh_ref[...]
            f = proj[0:C8]                                          # (C8, N)
            g = proj[C8:2 * C8]                                     # (C8, N)
            h = proj[2 * C8:3 * C8]                                 # (C8, N)
            f_s[...] = f.astype(jnp.bfloat16)
            g_s[...] = g.astype(jnp.bfloat16)
            # Hoist the v-conv above the attention matmul: (Wv@h) @ att == Wv@(h@att)
            vh = jnp.dot(wv_ref[...], h, preferred_element_type=jnp.float32)
            vh_s[...] = vh.astype(jnp.bfloat16)                     # (C, N)
            o_ref[0] = jnp.zeros((C, N), jnp.float32)

        # ---- per attention-row tile [i0, i0+TI), all columns j resident ----
        i0 = pl.multiple_of(it * TI, TI)
        f_t = f_s[:, pl.ds(i0, TI)]                                 # (C8, TI) bf16
        g = g_s[...]                                                # (C8, N)  bf16
        # s[i, j] = sum_c f[c, i] * g[c, j]  (contract C8 axis, no transpose)
        s = jax.lax.dot_general(f_t, g, (((0,), (0,)), ((), ())),
                                preferred_element_type=jnp.float32)  # (TI, N)
        m = jnp.max(s, axis=-1, keepdims=True)
        p = jnp.exp(s - m)
        l = jnp.sum(p, axis=-1, keepdims=True)
        att = (p * pl.reciprocal(l, approx=True)).astype(jnp.bfloat16)
        vh_t = vh_s[:, pl.ds(i0, TI)]                               # (C, TI) bf16
        o_ref[0] += jnp.dot(vh_t, att, preferred_element_type=jnp.float32)

        # ---- epilogue: bias + gamma scale ----------------------------------
        @pl.when(it == pl.num_programs(1) - 1)
        def _finish():
            o_ref[0] = gamma_ref[0] * (o_ref[0] + bv_ref[...])

    return kernel


def self_attention_pallas(x, params, block_i=None):
    """x: (B, C, W, H) float32, NCHW like PyTorch."""
    B, C, W, H = x.shape
    N = W * H
    assert C % 8 == 0, "in_channel must be a multiple of 8 (C//8 heads dim)"
    C8 = C // 8

    # Tile of attention rows per grid step (multiple of 128 keeps lanes dense;
    # 256 matches the v6e/v7x 256x256 MXU).
    if block_i is None:
        block_i = 256 if N % 256 == 0 else (128 if N % 128 == 0 else N)
    assert N % block_i == 0
    num_i = N // block_i

    x_flat = x.reshape(B, C, N)

    # Fuse the f/g/h weights into one projection; pad rows to a multiple of 8.
    rows = 3 * C8
    p3 = ((rows + 7) // 8) * 8
    w_fgh = jnp.concatenate([params["wf"], params["wg"], params["wh"]], axis=0)
    b_fgh = jnp.concatenate([params["bf"], params["bg"], params["bh"]], axis=0)
    if p3 != rows:
        w_fgh = jnp.pad(w_fgh, ((0, p3 - rows), (0, 0)))
        b_fgh = jnp.pad(b_fgh, ((0, p3 - rows), (0, 0)))
    gamma = params["gamma"].reshape((1,)).astype(jnp.float32)

    kernel = _make_kernel(C, C8, N, block_i)

    out_flat = pl.pallas_call(
        kernel,
        out_shape=jax.ShapeDtypeStruct((B, C, N), jnp.float32),
        grid=(B, num_i),
        in_specs=[
            pl.BlockSpec(memory_space=pltpu.MemorySpace.SMEM),      # gamma (scalar)
            pl.BlockSpec((1, C, N), lambda b, i: (b, 0, 0)),        # x (per batch)
            pl.BlockSpec((p3, C), lambda b, i: (0, 0)),             # fused Wf|Wg|Wh
            pl.BlockSpec((p3, 1), lambda b, i: (0, 0)),             # fused biases
            pl.BlockSpec((C, C8), lambda b, i: (0, 0)),             # Wv
            pl.BlockSpec((C, 1), lambda b, i: (0, 0)),              # bv
        ],
        out_specs=pl.BlockSpec((1, C, N), lambda b, i: (b, 0, 0)),
        scratch_shapes=[
            pltpu.VMEM((C8, N), jnp.bfloat16),                      # f (bf16)
            pltpu.VMEM((C8, N), jnp.bfloat16),                      # g (bf16)
            pltpu.VMEM((C, N), jnp.bfloat16),                       # Wv @ h (bf16)
        ],
        compiler_params=pltpu.CompilerParams(
            dimension_semantics=("parallel", "arbitrary")),
    )(gamma, x_flat, w_fgh, b_fgh, params["wv"], params["bv"])

    return out_flat.reshape(B, C, W, H)


def self_attention_ref(x, params):
    """Pure-JAX f32 reference mirroring the PyTorch forward."""
    B, C, W, H = x.shape
    N = W * H
    xf = x.reshape(B, C, N)
    f = jnp.einsum("oc,bcn->bon", params["wf"], xf) + params["bf"][None]
    g = jnp.einsum("oc,bcn->bon", params["wg"], xf) + params["bg"][None]
    h = jnp.einsum("oc,bcn->bon", params["wh"], xf) + params["bh"][None]
    att = jnp.einsum("bci,bcj->bij", f, g)
    att = jax.nn.softmax(att, axis=-1)
    sa = jnp.einsum("bci,bij->bcj", h, att)
    out = jnp.einsum("oc,bcn->bon", params["wv"], sa) + params["bv"][None]
    return (params["gamma"][0] * out).reshape(B, C, W, H)


def xavier_uniform(key, out_c, in_c):
    # kernel_size=1 -> fan_in=in_c, fan_out=out_c
    bound = (6.0 / (in_c + out_c)) ** 0.5
    return jax.random.uniform(key, (out_c, in_c), jnp.float32, -bound, bound)


def make_params(key, C):
    C8 = C // 8
    k = jax.random.split(key, 5)
    return {
        "wf": xavier_uniform(k[0], C8, C), "bf": jnp.zeros((C8, 1), jnp.float32),
        "wg": xavier_uniform(k[1], C8, C), "bg": jnp.zeros((C8, 1), jnp.float32),
        "wh": xavier_uniform(k[2], C8, C), "bh": jnp.zeros((C8, 1), jnp.float32),
        # v conv keeps PyTorch default init (not init_conv'd); deterministic stand-in:
        "wv": xavier_uniform(k[3], C, C8),
        "bv": 0.01 * jax.random.normal(k[4], (C, 1), jnp.float32),
        # nn.Parameter(torch.zeros(1))
        "gamma": jnp.zeros((1,), jnp.float32),
    }


if __name__ == "__main__":
    key = jax.random.PRNGKey(0)
    kx, kp = jax.random.split(key)

    B, C, W, H = 2, 16, 16, 16                      # C//8 = 2, N = 256
    x = jax.random.normal(kx, (B, C, W, H), jnp.float32)
    params = make_params(kp, C)

    # Module's actual init (gamma = 0): output must be exactly zero.
    # block_i=128 -> grid (2, 2): exercises the tiled accumulation path.
    out = jax.block_until_ready(self_attention_pallas(x, params, block_i=128))
    ref = self_attention_ref(x, params)
    assert jnp.allclose(out, ref, atol=1e-6), "mismatch at gamma=0"

    # Full datapath with nonzero gamma (bf16 MXU operands -> loosened tolerance).
    params_nz = dict(params, gamma=jnp.full((1,), 0.5, jnp.float32))
    out_nz = jax.block_until_ready(self_attention_pallas(x, params_nz, block_i=128))
    ref_nz = self_attention_ref(x, params_nz)
    assert jnp.allclose(out_nz, ref_nz, atol=2e-2, rtol=2e-2), "mismatch at gamma=0.5"

    print("KERNEL_OK")
</pallas_src>

<mosaic_0001>
module attributes {stable_mosaic.version = 11 : i64} {
  func.func @kernel(%arg0: i32, %arg1: i32, %arg2: memref<1xf32, #tpu.memory_space<smem>>, %arg3: memref<1x16x256xf32, #tpu.memory_space<vmem>>, %arg4: memref<8x16xf32, #tpu.memory_space<vmem>>, %arg5: memref<8x1xf32, #tpu.memory_space<vmem>>, %arg6: memref<16x2xf32, #tpu.memory_space<vmem>>, %arg7: memref<16x1xf32, #tpu.memory_space<vmem>>, %arg8: memref<1x16x256xf32, #tpu.memory_space<vmem>>, %arg9: memref<2x256xbf16, #tpu.memory_space<vmem>>, %arg10: memref<2x256xbf16, #tpu.memory_space<vmem>>, %arg11: memref<16x256xbf16, #tpu.memory_space<vmem>>) attributes {dimension_semantics = [#tpu.dimension_semantics<parallel>, #tpu.dimension_semantics<arbitrary>], iteration_bounds = array<i64: 2, 2>, scalar_prefetch = 0 : i64, scratch_operands = 3 : i64, tpu.core_type = #tpu.core_type<tc>, window_params = [{transform_indices = @transform_0, window_bounds = array<i64: 1>}, {transform_indices = @transform_1, window_bounds = array<i64: 1, 16, 256>}, {pipeline_mode = #tpu.pipeline_mode<synchronous>, transform_indices = @transform_2, window_bounds = array<i64: 8, 16>}, {pipeline_mode = #tpu.pipeline_mode<synchronous>, transform_indices = @transform_3, window_bounds = array<i64: 8, 1>}, {pipeline_mode = #tpu.pipeline_mode<synchronous>, transform_indices = @transform_4, window_bounds = array<i64: 16, 2>}, {pipeline_mode = #tpu.pipeline_mode<synchronous>, transform_indices = @transform_5, window_bounds = array<i64: 16, 1>}, {transform_indices = @transform_6, window_bounds = array<i64: 1, 16, 256>}]} {
    %c0_i32 = arith.constant 0 : i32
    %0 = arith.cmpi eq, %arg1, %c0_i32 : i32
    %1 = arith.extui %0 : i1 to i32
    %c0_i32_0 = arith.constant 0 : i32
    %2 = arith.cmpi ne, %1, %c0_i32_0 : i32
    scf.if %2 {
      %c0_14 = arith.constant 0 : index
      %c0_15 = arith.constant 0 : index
      %c0_16 = arith.constant 0 : index
      %32 = vector.load %arg3[%c0_14, %c0_15, %c0_16] : memref<1x16x256xf32, #tpu.memory_space<vmem>>, vector<1x16x256xf32>
      %33 = vector.shape_cast %32 : vector<1x16x256xf32> to vector<16x256xf32>
      %c0_17 = arith.constant 0 : index
      %c0_18 = arith.constant 0 : index
      %34 = vector.load %arg4[%c0_17, %c0_18] : memref<8x16xf32, #tpu.memory_space<vmem>>, vector<8x16xf32>
      %cst_19 = arith.constant dense<0.000000e+00> : vector<8x256xf32>
      %35 = tpu.matmul %34, %33, %cst_19 {dimension_numbers = #tpu.dot_dimension_numbers<[1], [0], [0], [1], [0, 0, 1, 1], [], []>} : vector<8x16xf32>, vector<16x256xf32>, vector<8x256xf32> -> vector<8x256xf32>
      %c0_20 = arith.constant 0 : index
      %c0_21 = arith.constant 0 : index
      %36 = vector.load %arg5[%c0_20, %c0_21] : memref<8x1xf32, #tpu.memory_space<vmem>>, vector<8x1xf32>
      %37 = vector.broadcast %36 : vector<8x1xf32> to vector<8x256xf32>
      %38 = arith.addf %35, %37 : vector<8x256xf32>
      %39 = vector.extract_strided_slice %38 {offsets = [0, 0], sizes = [2, 256], strides = [1, 1]} : vector<8x256xf32> to vector<2x256xf32>
      %40 = vector.extract_strided_slice %38 {offsets = [2, 0], sizes = [2, 256], strides = [1, 1]} : vector<8x256xf32> to vector<2x256xf32>
      %41 = vector.extract_strided_slice %38 {offsets = [4, 0], sizes = [2, 256], strides = [1, 1]} : vector<8x256xf32> to vector<2x256xf32>
      %42 = arith.truncf %39 : vector<2x256xf32> to vector<2x256xbf16>
      %c0_22 = arith.constant 0 : index
      %c0_23 = arith.constant 0 : index
      %43 = vector.load %arg9[%c0_22, %c0_23] : memref<2x256xbf16, #tpu.memory_space<vmem>>, vector<2x256xbf16>
      tpu.vector_store %arg9[%c0_22, %c0_23], %42 {strides = array<i32>} : memref<2x256xbf16, #tpu.memory_space<vmem>>, vector<2x256xbf16>,
      %44 = arith.truncf %40 : vector<2x256xf32> to vector<2x256xbf16>
      %c0_24 = arith.constant 0 : index
      %c0_25 = arith.constant 0 : index
      %45 = vector.load %arg10[%c0_24, %c0_25] : memref<2x256xbf16, #tpu.memory_space<vmem>>, vector<2x256xbf16>
      tpu.vector_store %arg10[%c0_24, %c0_25], %44 {strides = array<i32>} : memref<2x256xbf16, #tpu.memory_space<vmem>>, vector<2x256xbf16>,
      %c0_26 = arith.constant 0 : index
      %c0_27 = arith.constant 0 : index
      %46 = vector.load %arg6[%c0_26, %c0_27] : memref<16x2xf32, #tpu.memory_space<vmem>>, vector<16x2xf32>
      %cst_28 = arith.constant dense<0.000000e+00> : vector<16x256xf32>
      %47 = tpu.matmul %46, %41, %cst_28 {dimension_numbers = #tpu.dot_dimension_numbers<[1], [0], [0], [1], [0, 0, 1, 1], [], []>} : vector<16x2xf32>, vector<2x256xf32>, vector<16x256xf32> -> vector<16x256xf32>
      %48 = arith.truncf %47 : vector<16x256xf32> to vector<16x256xbf16>
      %c0_29 = arith.constant 0 : index
      %c0_30 = arith.constant 0 : index
      %49 = vector.load %arg11[%c0_29, %c0_30] : memref<16x256xbf16, #tpu.memory_space<vmem>>, vector<16x256xbf16>
      tpu.vector_store %arg11[%c0_29, %c0_30], %48 {strides = array<i32>} : memref<16x256xbf16, #tpu.memory_space<vmem>>, vector<16x256xbf16>,
      %cst_31 = arith.constant 0.000000e+00 : f32
      %50 = vector.broadcast %cst_31 : f32 to vector<16x256xf32>
      %c0_32 = arith.constant 0 : index
      %c0_33 = arith.constant 0 : index
      %c0_34 = arith.constant 0 : index
      %51 = vector.load %arg8[%c0_32, %c0_33, %c0_34] : memref<1x16x256xf32, #tpu.memory_space<vmem>>, vector<1x16x256xf32>
      %52 = vector.shape_cast %51 : vector<1x16x256xf32> to vector<16x256xf32>
      %53 = vector.shape_cast %50 : vector<16x256xf32> to vector<1x16x256xf32>
      tpu.vector_store %arg8[%c0_32, %c0_33, %c0_34], %53 {strides = array<i32>} : memref<1x16x256xf32, #tpu.memory_space<vmem>>, vector<1x16x256xf32>,
    } else {
    }
    %c128_i32 = arith.constant 128 : i32
    %3 = arith.muli %arg1, %c128_i32 : i32
    %4 = tpu.assume_multiple %3, 128 : i32
    %c0 = arith.constant 0 : index
    %5 = arith.index_cast %4 : i32 to index
    %6 = vector.load %arg9[%c0, %5] : memref<2x256xbf16, #tpu.memory_space<vmem>>, vector<2x128xbf16>
    %c0_1 = arith.constant 0 : index
    %c0_2 = arith.constant 0 : index
    %7 = vector.load %arg10[%c0_1, %c0_2] : memref<2x256xbf16, #tpu.memory_space<vmem>>, vector<2x256xbf16>
    %cst = arith.constant dense<0.000000e+00> : vector<128x256xf32>
    %8 = tpu.matmul %6, %7, %cst {dimension_numbers = #tpu.dot_dimension_numbers<[0], [0], [1], [1], [0, 1, 1, 1], [], []>} : vector<2x128xbf16>, vector<2x256xbf16>, vector<128x256xf32> -> vector<128x256xf32>
    %cst_3 = arith.constant dense<0xFF800000> : vector<128xf32>
    %9 = vector.multi_reduction <maximumf>, %8, %cst_3 [1] : vector<128x256xf32> to vector<128xf32>
    %10 = vector.shape_cast %9 : vector<128xf32> to vector<128x1xf32>
    %11 = vector.broadcast %10 : vector<128x1xf32> to vector<128x256xf32>
    %12 = arith.subf %8, %11 : vector<128x256xf32>
    %13 = math.exp %12 : vector<128x256xf32>
    %cst_4 = arith.constant dense<0.000000e+00> : vector<128xf32>
    %14 = vector.multi_reduction <add>, %13, %cst_4 [1] : vector<128x256xf32> to vector<128xf32>
    %15 = vector.shape_cast %14 : vector<128xf32> to vector<128x1xf32>
    %16 = tpu.reciprocal %15 {approx = true} : vector<128x1xf32> -> vector<128x1xf32>
    %17 = vector.broadcast %16 : vector<128x1xf32> to vector<128x256xf32>
    %18 = arith.mulf %13, %17 : vector<128x256xf32>
    %19 = arith.truncf %18 : vector<128x256xf32> to vector<128x256xbf16>
    %c0_5 = arith.constant 0 : index
    %20 = arith.index_cast %4 : i32 to index
    %21 = vector.load %arg11[%c0_5, %20] : memref<16x256xbf16, #tpu.memory_space<vmem>>, vector<16x128xbf16>
    %c0_6 = arith.constant 0 : index
    %c0_7 = arith.constant 0 : index
    %c0_8 = arith.constant 0 : index
    %22 = vector.load %arg8[%c0_6, %c0_7, %c0_8] : memref<1x16x256xf32, #tpu.memory_space<vmem>>, vector<1x16x256xf32>
    %23 = vector.shape_cast %22 : vector<1x16x256xf32> to vector<16x256xf32>
    %cst_9 = arith.constant dense<0.000000e+00> : vector<16x256xf32>
    %24 = tpu.matmul %21, %19, %cst_9 {dimension_numbers = #tpu.dot_dimension_numbers<[1], [0], [0], [1], [0, 0, 1, 1], [], []>} : vector<16x128xbf16>, vector<128x256xbf16>, vector<16x256xf32> -> vector<16x256xf32>
    %25 = arith.addf %23, %24 : vector<16x256xf32>
    %c0_10 = arith.constant 0 : index
    %c0_11 = arith.constant 0 : index
    %c0_12 = arith.constant 0 : index
    %26 = vector.load %arg8[%c0_10, %c0_11, %c0_12] : memref<1x16x256xf32, #tpu.memory_space<vmem>>, vector<1x16x256xf32>
    %27 = vector.shape_cast %26 : vector<1x16x256xf32> to vector<16x256xf32>
    %28 = vector.shape_cast %25 : vector<16x256xf32> to vector<1x16x256xf32>
    tpu.vector_store %arg8[%c0_10, %c0_11, %c0_12], %28 {strides = array<i32>} : memref<1x16x256xf32, #tpu.memory_space<vmem>>, vector<1x16x256xf32>,
    %c1_i32 = arith.constant 1 : i32
    %29 = arith.cmpi eq, %arg1, %c1_i32 : i32
    %30 = arith.extui %29 : i1 to i32
    %c0_i32_13 = arith.constant 0 : i32
    %31 = arith.cmpi ne, %30, %c0_i32_13 : i32
    scf.if %31 {
      %c0_14 = arith.constant 0 : index
      %32 = memref.load %arg2[%c0_14] : memref<1xf32, #tpu.memory_space<smem>>
      %c0_15 = arith.constant 0 : index
      %c0_16 = arith.constant 0 : index
      %c0_17 = arith.constant 0 : index
      %33 = vector.load %arg8[%c0_15, %c0_16, %c0_17] : memref<1x16x256xf32, #tpu.memory_space<vmem>>, vector<1x16x256xf32>
      %34 = vector.shape_cast %33 : vector<1x16x256xf32> to vector<16x256xf32>
      %c0_18 = arith.constant 0 : index
      %c0_19 = arith.constant 0 : index
      %35 = vector.load %arg7[%c0_18, %c0_19] : memref<16x1xf32, #tpu.memory_space<vmem>>, vector<16x1xf32>
      %36 = vector.broadcast %35 : vector<16x1xf32> to vector<16x256xf32>
      %37 = arith.addf %34, %36 : vector<16x256xf32>
      %38 = vector.broadcast %32 : f32 to vector<16x256xf32>
      %39 = arith.mulf %38, %37 : vector<16x256xf32>
      %c0_20 = arith.constant 0 : index
      %c0_21 = arith.constant 0 : index
      %c0_22 = arith.constant 0 : index
      %40 = vector.load %arg8[%c0_20, %c0_21, %c0_22] : memref<1x16x256xf32, #tpu.memory_space<vmem>>, vector<1x16x256xf32>
      %41 = vector.shape_cast %40 : vector<1x16x256xf32> to vector<16x256xf32>
      %42 = vector.shape_cast %39 : vector<16x256xf32> to vector<1x16x256xf32>
      tpu.vector_store %arg8[%c0_20, %c0_21, %c0_22], %42 {strides = array<i32>} : memref<1x16x256xf32, #tpu.memory_space<vmem>>, vector<1x16x256xf32>,
    } else {
    }
    return
  }
  func.func @transform_0(%arg0: i32, %arg1: i32) -> i32 {
    %c0_i32 = arith.constant 0 : i32
    %c0_i32_0 = arith.constant 0 : i32
    return %c0_i32 : i32
  }
  func.func @transform_1(%arg0: i32, %arg1: i32) -> (i32, i32, i32) {
    %c0_i32 = arith.constant 0 : i32
    %c0_i32_0 = arith.constant 0 : i32
    %c0_i32_1 = arith.constant 0 : i32
    return %arg0, %c0_i32, %c0_i32_0 : i32, i32, i32
  }
  func.func @transform_2(%arg0: i32, %arg1: i32) -> (i32, i32) {
    %c0_i32 = arith.constant 0 : i32
    %c0_i32_0 = arith.constant 0 : i32
    %c0_i32_1 = arith.constant 0 : i32
    return %c0_i32, %c0_i32_0 : i32, i32
  }
  func.func @transform_3(%arg0: i32, %arg1: i32) -> (i32, i32) {
    %c0_i32 = arith.constant 0 : i32
    %c0_i32_0 = arith.constant 0 : i32
    %c0_i32_1 = arith.constant 0 : i32
    return %c0_i32, %c0_i32_0 : i32, i32
  }
  func.func @transform_4(%arg0: i32, %arg1: i32) -> (i32, i32) {
    %c0_i32 = arith.constant 0 : i32
    %c0_i32_0 = arith.constant 0 : i32
    %c0_i32_1 = arith.constant 0 : i32
    return %c0_i32, %c0_i32_0 : i32, i32
  }
  func.func @transform_5(%arg0: i32, %arg1: i32) -> (i32, i32) {
    %c0_i32 = arith.constant 0 : i32
    %c0_i32_0 = arith.constant 0 : i32
    %c0_i32_1 = arith.constant 0 : i32
    return %c0_i32, %c0_i32_0 : i32, i32
  }
  func.func @transform_6(%arg0: i32, %arg1: i32) -> (i32, i32, i32) {
    %c0_i32 = arith.constant 0 : i32
    %c0_i32_0 = arith.constant 0 : i32
    %c0_i32_1 = arith.constant 0 : i32
    return %arg0, %c0_i32, %c0_i32_0 : i32, i32, i32
  }
}

</mosaic_0001>

<bundles_post_ra>
// kernel: tpu_custom_call.1
= control target key start
LH: loop header
LB: loop body
LE: loop exit
PB: predicated region body
PF: predicated region fallthrough
CT: control target
= control target key end

     0   :  { %s2022_s0 = inlined_call_operand.<no memory space> [shape: f32[1], index: 0, kind: input, shape index: {}]   ;;  %s2023_s1 = inlined_call_operand.hbm [shape: f32[2,16,256], index: 1, kind: input, shape index: {}]   ;;  %s2024_s2 = inlined_call_operand.vmem [shape: f32[8,16], index: 2, kind: input, shape index: {}]   ;;  %s2025_s3 = inlined_call_operand.vmem [shape: f32[8,1], index: 3, kind: input, shape index: {}]   ;;  %s2026_s4 = inlined_call_operand.vmem [shape: f32[16,2], index: 4, kind: input, shape index: {}]   ;;  %s2027_s5 = inlined_call_operand.vmem [shape: f32[16,1], index: 5, kind: input, shape index: {}]   ;;  %s2028_s6 = inlined_call_operand.hbm [shape: f32[2,16,256], index: 6, kind: output, shape index: {}]  }
   0x1   :  { %11 = sst [smem:[#allocation5]] %s2022_s0 }
   0x2   :  { %12 = vsyncpa [#allocation7], 0 }
   0x3   :  { %14 = vsyncpa [#allocation7 + $0x1], 0 }
   0x4   :  { %15 = vsyncpa [#allocation8], 0 }
   0x5   :  { %17 = vsyncpa [#allocation8 + $0x1], 0  ;;  %s1571_s23 = smov 0   ;;  %s1573_s24 = smov 0  }
   0x6   :  { %s1575_s25 = smov 0   ;;  %s1577_s26 = smov 0  }
   0x7   :  { %s1579_s27 = smov 0   ;;  %s1581_s28 = smov 0  }
   0x8   :  { %s1583_s29 = smov 0   ;;  %s1585_s30 = smov 0  }
   0x9 LB: > { %s1164_s0 = sadd.s32 4294967295, %s1519_s30   ;;  %s1165_s7 = sadd.s32 4294967294, %s1519_s30   ;;  %s1519_s30 = sphi %s1585_s30, %s23_s30   ;;  %s1515_s29 = sphi %s1583_s29, %s2045_s29   ;;  %s1511_s28 = sphi %s1581_s28, %s2044_s28   ;;  %s1507_s27 = sphi %s1579_s27, %s2043_s27   ;;  %s1503_s26 = sphi %s1577_s26, %s2042_s26   ;;  %s1499_s25 = sphi %s1575_s25, %s2041_s25   ;;  %s1495_s24 = sphi %s1573_s24, %s2040_s24   ;;  %s1491_s23 = sphi %s1571_s23, %s2039_s23  }
   0xa   : > { %s32_s8 = sadd.s32 1, %s1511_s28  ;;  %s35_s9 = sadd.s32 1, %s1515_s29 }
   0xb   : > { %p33_p0 = scmp.ge.s32.totalorder %s32_s8, 2  ;;  %s63_s10 = sadd.s32 1, %s1499_s25 }
   0xc   : > { %p70_p1 = scmp.ne.s32.totalorder %s1499_s25, %s1495_s24  ;;  %p71_p2 = scmp.eq.s32.totalorder %s1519_s30, 0 }
   0xd   : > { %s2047_s8 = smov (%p33_p0, %s32_s8), 0  ;;  %s2049_s9 = smov (!%p33_p0, %s35_s9), %s1515_s29 }
   0xe   : > { %2030 = sst [smem:[#allocation12_spill]] %s2047_s8  ;;  %p1622_p3 = por %p71_p2, %p70_p1 }
   0xf   : > { %p76_p4 = scmp.ne.s32.totalorder %s1495_s24, %s1491_s23  ;;  %p37_p5 = scmp.ge.s32.totalorder %s2049_s9, 2 }
  0x10   : > { %p77_p6 = scmp.eq.s32.totalorder %s1164_s0, 0  ;;  %p184_p7 = scmp.eq.s32.totalorder %s1164_s0, 3 }
  0x11   : > { %p190_p8 = scmp.eq.s32.totalorder %s1165_s7, 3  ;;  %s2051_s9 = smov (%p37_p5, %s2049_s9), 0 }
  0x12   : > { %2032 = sst [smem:[#allocation13_spill]] %s2051_s9  ;;  %p1630_p9 = por %p77_p6, %p76_p4 }
  0x13   : > { %p1634_p10 = por %p184_p7, %p70_p1  ;;  %s60_s14 = ssub.s32 %s1515_s29, %s2051_s9 }
  0x14   : > { %p1640_p11 = por %p190_p8, %p76_p4  ;;  %p61_p12 = scmp.eq.s32.totalorder %s60_s14, 0 }
  0x15   : > { %p1220_p13 = scmp.lt.s32.totalorder %s1519_s30, 4  ;;  %s225_s16 = sand.u32 1, %s1499_s25  }
  0x16   : > { %s1647_s17 = scalar_select %p61_p12, %s1499_s25, %s63_s10  }
  0x17   : > { %s1168_s18 = sshll.u32 %s225_s16, 5  ;;  %s1204_s19 = sshll.u32 %s1515_s29, 9 }
  0x18   : > { %s235_s22 = scalar_lea.hbm %s2023_s1, %s1204_s19  ;;  %s229_s0 = scalar_lea.vmem [#allocation6], %s1168_s18 }
  0x19   : > { %s236_s7 = sshll.u32 %s229_s0, 4  ;;  %p1655_p0 = pnand %p1220_p13, %p1622_p3  ;;  %s237_s7 = int_to_ptr.vmem [resolvable:$true] %s236_s7 }
  0x1a   : > { %p1171_p1 = scmp.ge.s32.totalorder %s1519_s30, 1  ;;  %s226_s14 = scalar_lea.sflag [#allocation7], %s225_s16 }
  0x1b   : > { %p1397_p2 = pneg %p1655_p0  ;;  %s1408_s10 = scalar_lea.vmem %s237_s7, 512 }
  0x1c   : > { %p1409_p4 = scmp.ne.s32.totalorder %s237_s7, %s1408_s10  ;;  %s1521_s8 = smov [#allocation6]  }
  0x1d   : > { %s1413_s20 = sshll.u32 %s1521_s8, 4  ;;  %s1414_s20 = int_to_ptr.vmem [resolvable:$false] %s1413_s20 }
  0x1e   : > { %p1411_p5 = pnand %p1409_p4, %p1397_p2  ;;  %s1415_s18 = scalar_lea.vmem %s1414_s20, 1024 }
  0x1f   : > { %p1416_p7 = scmp.lt.s32.totalorder %s237_s7, %s1414_s20  ;;  %p1417_p8 = scmp.lt.s32.totalorder %s1415_s18, %s1408_s10 }
  0x20   : > { %p1412_p6 = pneg %p1411_p5 }
  0x21   : > { %p1418_p12 = por %p1417_p8, %p1416_p7 }
  0x23   : > { %p1419_p3 = pnand %p1418_p12, %p1412_p6 }
  0x25   : > { %1422 = shalt.err (!%p1419_p3)
}
  0x26   : > { %s1522_s11 = smov 256   ;;  %s1523_s16 = smov 16  }
  0x27   : > { %1215 = dma.hbm_to_vmem [thread:$0]  (!%p1655_p0), %s235_s22, 512, %s237_s7, %s226_s14, %s1522_s11, %s1522_s11, %s1523_s16  }
  0x28   : > { %p244_p13 = scmp.lt.s32.totalorder %s1519_s30, 5 }
  0x2a   : > { %p245_p2 = pnand %p1171_p1, %p244_p13 }
  0x2b   : > { %s1668_s8 = sand.u32 (!%p245_p2), 1, %s1495_s24  }
  0x2c   : > { %248 = sbr.rel (%p245_p2) target bundleno = 1542 (0x606), region = 44  ;;  %s1172_s19 = sshll.u32 (!%p245_p2), %s1668_s8, 5 }
  0x2d   : > { %s251_s21 = scalar_lea.sflag (!%p245_p2), [#allocation7], %s1668_s8  ;;  %s254_s0 = scalar_lea.vmem (!%p245_p2), [#allocation6], %s1172_s19 }
  0x31   : > { %1482 = dma.done.wait (%p1630_p9), %s251_s21, 512  }
  0x32   : > { %1484 = vsyncadd (%p1630_p9), %s251_s21, 4294966784  ;;  %s1676_s9 = scalar_lea.vmem [#allocation9], %s1172_s19  ;;  %p1174_p0 = scmp.ne.s32.totalorder %s1503_s26, 0 }
  0x34   : > { %287 = sbr.rel (%p1174_p0) target bundleno = 465 (0x1d1), region = 52 }
  0x39   : > { %v291_v0 = vld [vmem:[%s254_s0 + $0x18] sm:$0xff]  ;;  %v290_v1 = vld [vmem:[%s254_s0 + $0x10] sm:$0xff]  ;;  %v289_v2 = vld [vmem:[%s254_s0 + $0x8] sm:$0xff]  ;;  %v1524_v4 = vmov 0.0   ;;  %vm299_vm0 = vcmask 130048   ;;  %v1525_v7 = vmov 0   ;;  %v382_v10 = vlaneseq }
  0x3a   : > { %331 = vmatprep.subr.mxu0 %v291_v0  ;;  %v288_v3 = vld [vmem:[%s254_s0] sm:$0xff]  ;;  %367 = vmatprep.mubr.f32.mxu0 %v1524_v4  ;;  %514 = vst [vmem:[%s1676_s9] sm:$0xff] %v1524_v4  ;;  %515 = vst [vmem:[%s1676_s9 + $0x8] sm:$0xff] %v1524_v4  ;;  %v293_v5 = vld [vmem:[%s2025_s3] sm:$0xff]  ;;  %v1526_v8 = vmov 1966171168   ;;  %vm418_vm1 = vcmask 1041408  }
  0x3b   : > { %516 = vst [vmem:[%s1676_s9 + $0x10] sm:$0xff] %v1524_v4  ;;  %517 = vst [vmem:[%s1676_s9 + $0x18] sm:$0xff] %v1524_v4  ;;  %332 = vmatpush1.msra.mxu0 %v290_v1  ;;  %v292_v6 = vld [vmem:[%s2024_s2] sm:$0xff]  ;;  %1296 = vset.pattern.permute.xlu0 %v1525_v7  ;;  %v380_v9 = vunpack.c.l.s4 %v1526_v8  ;;  %v383_v13 = vshrl.u32 %v382_v10, 7  ;;  %vm411_vm2 = vcmask 15360   ;;  %v406_v25 = vld [vmem:[%s2026_s4 + $0x8] sm:$0xff] }
  0x3c   : > { %333 = vmatprep.subr.mxu0 %v289_v2  ;;  %296 = vperm.xlu0 %1296, %v293_v5   ;;  %v405_v22 = vld [vmem:[%s2026_s4] sm:$0xff] }
  0x3d   : > { %334 = vmatpush1.msra.mxu0 %v288_v3  ;;  %487 = vmatprep.mubr.f32.mxu1 %v1524_v4  ;;  %v381_v12 = vunpack.c.0.s8 %v380_v9 }
  0x3e   : > { %1175 = vmatmul.mubr.msk.f32.vlgmr.msra.gmra.mxu0 %vm299_vm0, %v292_v6 }
  0x3f   : > { %v384_v18 = vsub.s32 %v381_v12, %v383_v13 }
  0xb7   : > { %v297_v11 = vpop.permute.xlu0 %296 }
  0xfe   : > { %v369_v14 = vpop.f32.mrf.mxu0 }
  0xff   : > { %v370_v15 = vadd.f32 %v369_v14, %v297_v11 }
 0x100   : > { %v371_v16 = vpop.f32.mrf.mxu0 }
 0x101   : > { %v372_v17 = vadd.f32 %v371_v16, %v297_v11  ;;  %v409_v21 = vrot.slane %v370_v15, 4 }
 0x103   : > { %v1176_v19 = vpack.c.bf16 %v372_v17, %v370_v15  ;;  %v410_v20 = vrot.slane %v372_v17, 4 }
 0x105   : > { %v385_v23 = vrot.slane %v1176_v19, %v384_v18  ;;  %1179 = vmatprep.subr.msk.mxu1 %vm418_vm1, %v410_v20 }
 0x106   : > { %1180 = vmatpush1.msk.msra.mxu1 %vm418_vm1, %v409_v21 }
 0x107   : > { %1177 = vst.sshfl [vmem:[#allocation2] sm:$0x5 pattern:$0x73625140] %v385_v23  ;;  %v395_v24 = vcombine.high %v385_v23, %v385_v23  ;;  %1181 = vmatmul.mubr.msk.f32.vlgmr.msra.gmra.mxu1 %vm411_vm2, %v405_v22 }
 0x108   : > { %493 = vmatprep.mubr.f32.mxu1 %v1524_v4 }
 0x109   : > { %1178 = vst.sshfl [vmem:[#allocation3] sm:$0x5 pattern:$0x73625140] %v395_v24 }
 0x10b   : > { %1182 = vmatmul.mubr.msk.f32.gmra.mxu1 %vm411_vm2, %v406_v25 }
 0x1c7   : > { %v489_v26 = vpop.f32.mrf.mxu1 }
 0x1c9   : > { %v491_v27 = vpop.f32.mrf.mxu1 }
 0x1ca   : > { %v1205_v28 = vpack.c.bf16 %v491_v27, %v489_v26 }
 0x1cb   : > { %v495_v29 = vpop.f32.mrf.mxu1 }
 0x1cc   : > { %512 = vst [vmem:[#allocation4] sm:$0xff] %v1205_v28 }
 0x1cd   : > { %v497_v30 = vpop.f32.mrf.mxu1 }
 0x1ce   : > { %v1206_v31 = vpack.c.bf16 %v497_v30, %v495_v29 }
 0x1d0   : > { %513 = vst [vmem:[#allocation4 + $0x8] sm:$0xff] %v1206_v31 }
 0x1d1 PF: > { %s1185_s16 = sshll.u32 %s1503_s26, 7  ;;  %v1186_v32 = vld.sshfl [vmem:[#allocation3] sm:$0x11 pattern:$0x75316420]  ;;  %v552_v33 = vlaneseq  ;;  %v1528_v37 = vmov 0  }
 0x1d2   : > { %s519_s19 = sshra.s32 %s1185_s16, 7  ;;  %v1527_v34 = vmov 1966171168   ;;  %627 = vmatprep.mubr.bf16.mxu0 %v1528_v37  ;;  %1010 = vmatprep.mubr.bf16.mxu1 %v1528_v37  ;;  %v548_v39 = vcombine.high %v1186_v32, %v1186_v32  ;;  %vm588_vm3 = vcmask 1040384   ;;  %vm563_vm4 = vcmask 15360   ;;  %p1198_p9 = scmp.ne.s32.totalorder %s1503_s26, 1 }
 0x1d3   : > { %s1196_s21 = sshll.u32 %s519_s19, 2  ;;  %v550_v35 = vunpack.c.l.s4 %v1527_v34  ;;  %v553_v36 = vshrl.u32 %v552_v33, 7  ;;  %s521_s0 = scalar_lea.vmem [#allocation2], %s519_s19 }
 0x1d4   : > { %v522_v38 = vld [vmem:[%s521_s0] sm:$0x1]  ;;  %s1696_s12 = scalar_lea.vmem [#allocation4], %s1196_s21  ;;  %s1033_s26 = sld [smem:[#allocation5]] (!%p1198_p9) }
 0x1d5   : > { %524 = vxpose.xlu0.c.b16.start.end [1/1] (short) %v522_v38, 128  ;;  %v551_v40 = vunpack.c.0.s8 %v550_v35 }
 0x1d7   : > { %v554_v41 = vsub.s32 %v551_v40, %v553_v36 }
 0x1d9   : > { %v562_v42 = vrot.slane %v548_v39, %v554_v41  ;;  %v555_v43 = vrot.slane %v1186_v32, %v554_v41 }
 0x1db   : > { %1187 = vmatprep.subr.msk.bf16.mxu0 %vm588_vm3, %v562_v42  ;;  %v590_v44 = vsel %vm588_vm3, %v555_v43, 0 }
 0x1dc   : > { %610 = vmatpush1.bf16.msra.mxu0 %v590_v44 }
 0x237   : > { %v532_v45 = vpop.trf.xlu0 }
 0x238   : > { %1188 = vmatmul.mubr.msk.bf16.vlgmr.msra.gmra.mxu0 %vm563_vm4, %v532_v45 }
 0x239   : > { %637 = vmatprep.mubr.bf16.mxu0 %v1528_v37 }
 0x23b   : > { %v533_v46 = vpop.trf.xlu0 }
 0x23f   : > { %v534_v47 = vpop.trf.xlu0 }
 0x240   : > { %1189 = vmatmul.mubr.msk.bf16.gmra.mxu0 %vm563_vm4, %v533_v46 }
 0x241   : > { %647 = vmatprep.mubr.bf16.mxu0 %v1528_v37 }
 0x243   : > { %v535_v48 = vpop.trf.xlu0 }
 0x247   : > { %v536_v49 = vpop.trf.xlu0 }
 0x248   : > { %1190 = vmatmul.mubr.msk.bf16.gmra.mxu0 %vm563_vm4, %v534_v47 }
 0x249   : > { %657 = vmatprep.mubr.bf16.mxu0 %v1528_v37 }
 0x24b   : > { %v537_v50 = vpop.trf.xlu0 }
 0x24f   : > { %v538_v51 = vpop.trf.xlu0 }
 0x250   : > { %1191 = vmatmul.mubr.msk.bf16.gmra.mxu0 %vm563_vm4, %v535_v48 }
 0x251   : > { %667 = vmatprep.mubr.bf16.mxu0 %v1528_v37 }
 0x253   : > { %v539_v52 = vpop.trf.xlu0 }
 0x258   : > { %1192 = vmatmul.mubr.msk.bf16.gmra.mxu0 %vm563_vm4, %v536_v49 }
 0x259   : > { %677 = vmatprep.mubr.bf16.mxu0 %v1528_v37 }
 0x260   : > { %1193 = vmatmul.mubr.msk.bf16.gmra.mxu0 %vm563_vm4, %v537_v50 }
 0x261   : > { %687 = vmatprep.mubr.bf16.mxu0 %v1528_v37 }
 0x268   : > { %1194 = vmatmul.mubr.msk.bf16.gmra.mxu0 %vm563_vm4, %v538_v51 }
 0x269   : > { %697 = vmatprep.mubr.bf16.mxu0 %v1528_v37 }
 0x270   : > { %1195 = vmatmul.mubr.msk.bf16.gmra.mxu0 %vm563_vm4, %v539_v52 }
 0x2f8   : > { %v1706_v53 = vpop.f32.mrf.mxu0 }
 0x2fa   : > { %v1708_v54 = vpop.f32.mrf.mxu0 }
 0x2fb   : > { %v708_v36 = vmax.f32 %v1706_v53, %v1708_v54 }
 0x2fc   : > { %v1710_v55 = vpop.f32.mrf.mxu0 }
 0x2fe   : > { %v1712_v56 = vpop.f32.mrf.mxu0 }
 0x2ff   : > { %v711_v27 = vmax.f32 %v1710_v55, %v1712_v56 }
 0x300   : > { %v1714_v57 = vpop.f32.mrf.mxu0 }
 0x302   : > { %v1716_v58 = vpop.f32.mrf.mxu0 }
 0x303   : > { %v714_v35 = vmax.f32 %v1714_v57, %v1716_v58 }
 0x304   : > { %v1718_v59 = vpop.f32.mrf.mxu0 }
 0x306   : > { %v1720_v60 = vpop.f32.mrf.mxu0 }
 0x307   : > { %v717_v24 = vmax.f32 %v1718_v59, %v1720_v60 }
 0x308   : > { %v1722_v61 = vpop.f32.mrf.mxu0 }
 0x30a   : > { %v1724_v62 = vpop.f32.mrf.mxu0 }
 0x30b   : > { %v720_v33 = vmax.f32 %v1722_v61, %v1724_v62 }
 0x30c   : > { %v1726_v63 = vpop.f32.mrf.mxu0 }
 0x30e   : > { %v1728_v0 = vpop.f32.mrf.mxu0 }
 0x30f   : > { %v723_v34 = vmax.f32 %v1726_v63, %v1728_v0 }
 0x310   : > { %v1730_v1 = vpop.f32.mrf.mxu0 }
 0x312   : > { %v1732_v2 = vpop.f32.mrf.mxu0 }
 0x313   : > { %v726_v31 = vmax.f32 %v1730_v1, %v1732_v2 }
 0x314   : > { %v1734_v3 = vpop.f32.mrf.mxu0 }
 0x316   : > { %v1736_v4 = vpop.f32.mrf.mxu0 }
 0x317   : > { %v729_v32 = vmax.f32 %v1734_v3, %v1736_v4 }
 0x318   : > { %v1738_v5 = vpop.f32.mrf.mxu0 }
 0x31a   : > { %v1740_v6 = vpop.f32.mrf.mxu0 }
 0x31b   : > { %v732_v26 = vmax.f32 %v1738_v5, %v1740_v6 }
 0x31c   : > { %v1742_v7 = vpop.f32.mrf.mxu0 }
 0x31e   : > { %v1744_v8 = vpop.f32.mrf.mxu0 }
 0x31f   : > { %v735_v30 = vmax.f32 %v1742_v7, %v1744_v8 }
 0x320   : > { %v1746_v9 = vpop.f32.mrf.mxu0 }
 0x322   : > { %v1748_v10 = vpop.f32.mrf.mxu0 }
 0x323   : > { %v738_v21 = vmax.f32 %v1746_v9, %v1748_v10 }
 0x324   : > { %v1750_v11 = vpop.f32.mrf.mxu0 }
 0x326   : > { %v1752_v12 = vpop.f32.mrf.mxu0 }
 0x327   : > { %v741_v23 = vmax.f32 %v1750_v11, %v1752_v12 }
 0x328   : > { %v689_v13 = vpop.f32.mrf.mxu0 }
 0x32a   : > { %v691_v14 = vpop.f32.mrf.mxu0 }
 0x32b   : > { %v744_v15 = vmax.f32 %v689_v13, %v691_v14 }
 0x32c   : > { %v1754_v16 = vpop.f32.mrf.mxu0 }
 0x32d   : > { %745 = vmax.xlane.f32.xlu1 %v744_v15 }
 0x32e   : > { %v1756_v17 = vpop.f32.mrf.mxu0 }
 0x32f   : > { %v747_v18 = vmax.f32 %v1754_v16, %v1756_v17 }
 0x330   : > { %v699_v19 = vpop.f32.mrf.mxu0 }
 0x331   : > { %748 = vmax.xlane.f32.xlu1 %v747_v18 }
 0x332   : > { %v701_v20 = vpop.f32.mrf.mxu0 }
 0x333   : > { %v750_v22 = vmax.f32 %v699_v19, %v701_v20 }
 0x334   : > { %v703_v25 = vpop.f32.mrf.mxu0 }
 0x335   : > { %739 = vmax.xlane.f32.xlu1 %v738_v21  ;;  %751 = vmax.xlane.f32.xlu0 %v750_v22 }
 0x336   : > { %v705_v28 = vpop.f32.mrf.mxu0 }
 0x337   : > { %v753_v29 = vmax.f32 %v703_v25, %v705_v28 }
 0x339   : > { %742 = vmax.xlane.f32.xlu1 %v741_v23  ;;  %718 = vmax.xlane.f32.xlu0 %v717_v24 }
 0x33d   : > { %733 = vmax.xlane.f32.xlu1 %v732_v26  ;;  %712 = vmax.xlane.f32.xlu0 %v711_v27 }
 0x341   : > { %754 = vmax.xlane.f32.xlu1 %v753_v29 }
 0x345   : > { %736 = vmax.xlane.f32.xlu1 %v735_v30 }
 0x349   : > { %727 = vmax.xlane.f32.xlu1 %v726_v31 }
 0x34d   : > { %730 = vmax.xlane.f32.xlu1 %v729_v32 }
 0x351   : > { %721 = vmax.xlane.f32.xlu1 %v720_v33 }
 0x355   : > { %724 = vmax.xlane.f32.xlu1 %v723_v34 }
 0x359   : > { %715 = vmax.xlane.f32.xlu1 %v714_v35 }
 0x35d   : > { %709 = vmax.xlane.f32.xlu1 %v708_v36 }
 0x3b6   : > { %v746_v37 = vpop.xlane.xlu1 %745 }
 0x3b7   : > { %v780_v41 = vsub.f32 %v689_v13, %v746_v37  ;;  %v781_v43 = vsub.f32 %v691_v14, %v746_v37 }
 0x3b9   : > { %v836_v48 = vmul.f32 1.442695, %v780_v41  ;;  %v838_v50 = vmul.f32 1.442695, %v781_v43 }
 0x3ba   : > { %v749_v38 = vpop.xlane.xlu1 %748 }
 0x3bb   : > { %v782_v14 = vsub.f32 %v1754_v16, %v749_v38  ;;  %v783_v21 = vsub.f32 %v1756_v17, %v749_v38 }
 0x3bd   : > { %v840_v24 = vmul.f32 1.442695, %v782_v14 }
 0x3be   : > { %v740_v39 = vpop.xlane.xlu1 %739  ;;  %v752_v40 = vpop.xlane.xlu0 %751 }
 0x3bf   : > { %v784_v42 = vsub.f32 %v699_v19, %v752_v40  ;;  %v785_v44 = vsub.f32 %v701_v20, %v752_v40  ;;  %v776_v49 = vsub.f32 %v1746_v9, %v740_v39  ;;  %v777_v51 = vsub.f32 %v1748_v10, %v740_v39 }
 0x3c1   : > { %v844_v45 = vmul.f32 1.442695, %v784_v42  ;;  %v846_v46 = vmul.f32 1.442695, %v785_v44  ;;  %v828_v15 = vmul.f32 1.442695, %v776_v49 }
 0x3c2   : > { %v743_v47 = vpop.xlane.xlu1 %742  ;;  %v830_v19 = vmul.f32 1.442695, %v777_v51  ;;  %v719_v41 = vpop.xlane.xlu0 %718 }
 0x3c3   : > { %1298 = vpow2.f32 %v844_v45  ;;  %v778_v26 = vsub.f32 %v1750_v11, %v743_v47  ;;  %v779_v29 = vsub.f32 %v1752_v12, %v743_v47  ;;  %v763_v14 = vsub.f32 %v1720_v60, %v719_v41 }
 0x3c4   : > { %1300 = vpow2.f32 %v846_v46 }
 0x3c5   : > { %1302 = vpow2.f32 %v836_v48  ;;  %v832_v17 = vmul.f32 1.442695, %v778_v26  ;;  %v802_v26 = vmul.f32 1.442695, %v763_v14 }
 0x3c6   : > { %v734_v52 = vpop.xlane.xlu1 %733  ;;  %1304 = vpow2.f32 %v838_v50 }
 0x3c7   : > { %v772_v18 = vsub.f32 %v1738_v5, %v734_v52  ;;  %v773_v13 = vsub.f32 %v1740_v6, %v734_v52  ;;  %1306 = vpow2.f32 %v828_v15  ;;  %v842_v6 = vmul.f32 1.442695, %v783_v21 }
 0x3c8   : > { %1308 = vpow2.f32 %v830_v19  ;;  %v762_v52 = vsub.f32 %v1718_v59, %v719_v41  ;;  %v713_v19 = vpop.xlane.xlu0 %712 }
 0x3c9   : > { %v820_v20 = vmul.f32 1.442695, %v772_v18  ;;  %v822_v9 = vmul.f32 1.442695, %v773_v13 }
 0x3ca   : > { %v755_v22 = vpop.xlane.xlu1 %754  ;;  %v800_v60 = vmul.f32 1.442695, %v762_v52 }
 0x3cb   : > { %v786_v10 = vsub.f32 %v703_v25, %v755_v22  ;;  %v787_v23 = vsub.f32 %v705_v28, %v755_v22  ;;  %1310 = vpow2.f32 %v820_v20  ;;  %v834_v28 = vmul.f32 1.442695, %v779_v29 }
 0x3cc   : > { %1312 = vpow2.f32 %v822_v9  ;;  %v758_v22 = vsub.f32 %v1710_v55, %v713_v19 }
 0x3cd   : > { %v848_v5 = vmul.f32 1.442695, %v786_v10  ;;  %v850_v27 = vmul.f32 1.442695, %v787_v23 }
 0x3ce   : > { %v737_v16 = vpop.xlane.xlu1 %736 }
 0x3cf   : > { %1314 = vpow2.f32 %v848_v5  ;;  %v774_v30 = vsub.f32 %v1742_v7, %v737_v16  ;;  %v775_v11 = vsub.f32 %v1744_v8, %v737_v16  ;;  %v759_v5 = vsub.f32 %v1712_v56, %v713_v19 }
 0x3d0   : > { %1316 = vpow2.f32 %v850_v27  ;;  %v1793_v25 = vpop.eup %1298  ;;  %v792_v56 = vmul.f32 1.442695, %v758_v22 }
 0x3d1   : > { %1318 = vpow2.f32 %v840_v24  ;;  %v1796_v32 = vpop.eup %1300  ;;  %v824_v7 = vmul.f32 1.442695, %v774_v30  ;;  %v826_v8 = vmul.f32 1.442695, %v775_v11  ;;  %v794_v11 = vmul.f32 1.442695, %v759_v5 }
 0x3d2   : > { %1320 = vpow2.f32 %v842_v6  ;;  %v728_v31 = vpop.xlane.xlu1 %727  ;;  %v1800_v34 = vpop.eup %1302  ;;  %v894_v35 = vadd.f32 %v1796_v32, %v1793_v25 }
 0x3d3   : > { %v768_v33 = vsub.f32 %v1730_v1, %v728_v31  ;;  %v769_v12 = vsub.f32 %v1732_v2, %v728_v31  ;;  %v1804_v36 = vpop.eup %1304  ;;  %1322 = vpow2.f32 %v832_v17 }
 0x3d4   : > { %1324 = vpow2.f32 %v834_v28  ;;  %895 = vadd.xlane.f32.xlu1 %v894_v35  ;;  %v1808_v40 = vpop.eup %1306  ;;  %v888_v42 = vadd.f32 %v1804_v36, %v1800_v34 }
 0x3d5   : > { %v812_v37 = vmul.f32 1.442695, %v768_v33  ;;  %v814_v38 = vmul.f32 1.442695, %v769_v12  ;;  %v1812_v43 = vpop.eup %1308 }
 0x3d6   : > { %v731_v39 = vpop.xlane.xlu1 %730  ;;  %v882_v50 = vadd.f32 %v1812_v43, %v1808_v40 }
 0x3d7   : > { %1326 = vpow2.f32 %v812_v37  ;;  %v770_v1 = vsub.f32 %v1734_v3, %v731_v39  ;;  %v771_v2 = vsub.f32 %v1736_v4, %v731_v39 }
 0x3d8   : > { %1328 = vpow2.f32 %v814_v38  ;;  %v1814_v45 = vpop.eup %1310  ;;  %889 = vadd.xlane.f32.xlu1 %v888_v42 }
 0x3d9   : > { %1330 = vpow2.f32 %v824_v7  ;;  %v816_v44 = vmul.f32 1.442695, %v770_v1  ;;  %v818_v46 = vmul.f32 1.442695, %v771_v2  ;;  %v1816_v3 = vpop.eup %1312 }
 0x3da   : > { %1332 = vpow2.f32 %v826_v8  ;;  %v722_v47 = vpop.xlane.xlu1 %721  ;;  %v876_v9 = vadd.f32 %v1816_v3, %v1814_v45 }
 0x3db   : > { %v764_v4 = vsub.f32 %v1722_v61, %v722_v47  ;;  %v765_v48 = vsub.f32 %v1724_v62, %v722_v47  ;;  %1334 = vpow2.f32 %v816_v44 }
 0x3dc   : > { %v1820_v49 = vpop.eup %1314  ;;  %1336 = vpow2.f32 %v818_v46  ;;  %883 = vadd.xlane.f32.xlu1 %v882_v50 }
 0x3dd   : > { %v1824_v51 = vpop.eup %1316  ;;  %v804_v15 = vmul.f32 1.442695, %v764_v4  ;;  %v806_v18 = vmul.f32 1.442695, %v765_v48 }
 0x3de   : > { %v1827_v13 = vpop.eup %1318  ;;  %v725_v61 = vpop.xlane.xlu1 %724  ;;  %v897_v62 = vadd.f32 %v1824_v51, %v1820_v49 }
 0x3df   : > { %v1832_v20 = vpop.eup %1320  ;;  %1338 = vpow2.f32 %v804_v15  ;;  %v766_v21 = vsub.f32 %v1726_v63, %v725_v61  ;;  %v767_v59 = vsub.f32 %v1728_v0, %v725_v61 }
 0x3e0   : > { %1340 = vpow2.f32 %v806_v18  ;;  %898 = vadd.xlane.f32.xlu0 %v897_v62  ;;  %v1839_v24 = vpop.eup %1322  ;;  %877 = vadd.xlane.f32.xlu1 %v876_v9  ;;  %v891_v63 = vadd.f32 %v1832_v20, %v1827_v13 }
 0x3e1   : > { %v808_v10 = vmul.f32 1.442695, %v766_v21  ;;  %v810_v23 = vmul.f32 1.442695, %v767_v59  ;;  %v1844_v0 = vpop.eup %1324 }
 0x3e2   : > { %v716_v27 = vpop.xlane.xlu1 %715 }
 0x3e3   : > { %1342 = vpow2.f32 %v808_v10  ;;  %v760_v6 = vsub.f32 %v1714_v57, %v716_v27  ;;  %v761_v29 = vsub.f32 %v1716_v58, %v716_v27  ;;  %v885_v57 = vadd.f32 %v1844_v0, %v1839_v24 }
 0x3e4   : > { %v1848_v55 = vpop.eup %1326  ;;  %1344 = vpow2.f32 %v810_v23  ;;  %892 = vadd.xlane.f32.xlu0 %v891_v63 }
 0x3e5   : > { %v1850_v16 = vpop.eup %1328  ;;  %1346 = vpow2.f32 %v800_v60  ;;  %v796_v17 = vmul.f32 1.442695, %v760_v6  ;;  %v798_v30 = vmul.f32 1.442695, %v761_v29 }
 0x3e6   : > { %v1852_v28 = vpop.eup %1330  ;;  %1348 = vpow2.f32 %v802_v26  ;;  %v710_v31 = vpop.xlane.xlu1 %709  ;;  %v870_v58 = vadd.f32 %v1850_v16, %v1848_v55 }
 0x3e7   : > { %v1858_v33 = vpop.eup %1332  ;;  %1350 = vpow2.f32 %v796_v17  ;;  %v756_v12 = vsub.f32 %v1706_v53, %v710_v31  ;;  %v757_v35 = vsub.f32 %v1708_v54, %v710_v31 }
 0x3e8   : > { %1352 = vpow2.f32 %v798_v30  ;;  %886 = vadd.xlane.f32.xlu0 %v885_v57  ;;  %871 = vadd.xlane.f32.xlu1 %v870_v58  ;;  %v1862_v38 = vpop.eup %1334  ;;  %v879_v8 = vadd.f32 %v1858_v33, %v1852_v28 }
 0x3e9   : > { %1354 = vpow2.f32 %v792_v56  ;;  %v788_v7 = vmul.f32 1.442695, %v756_v12  ;;  %v790_v37 = vmul.f32 1.442695, %v757_v35  ;;  %v1866_v39 = vpop.eup %1336 }
 0x3ea   : > { %1356 = vpow2.f32 %v794_v11  ;;  %v873_v54 = vadd.f32 %v1866_v39, %v1862_v38 }
 0x3eb   : > { %1358 = vpow2.f32 %v788_v7 }
 0x3ec   : > { %v1868_v1 = vpop.eup %1338  ;;  %1360 = vpow2.f32 %v790_v37  ;;  %880 = vadd.xlane.f32.xlu0 %v879_v8 }
 0x3ed   : > { %v1870_v53 = vpop.eup %1340 }
 0x3ee   : > { %v864_v2 = vadd.f32 %v1870_v53, %v1868_v1 }
 0x3f0   : > { %v1876_v41 = vpop.eup %1342  ;;  %874 = vadd.xlane.f32.xlu0 %v873_v54  ;;  %865 = vadd.xlane.f32.xlu1 %v864_v2 }
 0x3f1   : > { %v1878_v42 = vpop.eup %1344 }
 0x3f2   : > { %v1880_v44 = vpop.eup %1346  ;;  %v867_v46 = vadd.f32 %v1878_v42, %v1876_v41 }
 0x3f3   : > { %v1884_v47 = vpop.eup %1348 }
 0x3f4   : > { %v1886_v4 = vpop.eup %1350  ;;  %868 = vadd.xlane.f32.xlu0 %v867_v46  ;;  %v861_v52 = vadd.f32 %v1884_v47, %v1880_v44 }
 0x3f5   : > { %v1888_v48 = vpop.eup %1352 }
 0x3f6   : > { %v1890_v50 = vpop.eup %1354  ;;  %v858_v15 = vadd.f32 %v1888_v48, %v1886_v4 }
 0x3f7   : > { %v1896_v18 = vpop.eup %1356 }
 0x3f8   : > { %v1898_v14 = vpop.eup %1358  ;;  %862 = vadd.xlane.f32.xlu0 %v861_v52  ;;  %859 = vadd.xlane.f32.xlu1 %v858_v15  ;;  %v855_v61 = vadd.f32 %v1896_v18, %v1890_v50 }
 0x3f9   : > { %v1900_v19 = vpop.eup %1360 }
 0x3fa   : > { %v852_v62 = vadd.f32 %v1900_v19, %v1898_v14 }
 0x3fc   : > { %856 = vadd.xlane.f32.xlu0 %v855_v61  ;;  %853 = vadd.xlane.f32.xlu1 %v852_v62 }
 0x45d   : > { %v896_v21 = vpop.xlane.xlu1 %895 }
 0x45e   : > { %1362 = vrcp.f32 %v896_v21 }
 0x461   : > { %v890_v59 = vpop.xlane.xlu1 %889 }
 0x465   : > { %v884_v60 = vpop.xlane.xlu1 %883 }
 0x469   : > { %v899_v9 = vpop.xlane.xlu0 %898  ;;  %v878_v10 = vpop.xlane.xlu1 %877 }
 0x46a   : > { %1364 = vrcp.f32 %v899_v9 }
 0x46b   : > { %1366 = vrcp.f32 %v890_v59  ;;  %v1363_v26 = vpop.eup %1362 }
 0x46c   : > { %v945_v6 = vmul.f32 %v1363_v26, %v1796_v32  ;;  %v944_v17 = vmul.f32 %v1363_v26, %v1793_v25 }
 0x46d   : > { %v893_v22 = vpop.xlane.xlu0 %892 }
 0x46e   : > { %1368 = vrcp.f32 %v893_v22 }
 0x46f   : > { %1370 = vrcp.f32 %v884_v60 }
 0x471   : > { %v887_v23 = vpop.xlane.xlu0 %886  ;;  %v872_v5 = vpop.xlane.xlu1 %871 }
 0x472   : > { %1372 = vrcp.f32 %v887_v23 }
 0x473   : > { %1374 = vrcp.f32 %v878_v10 }
 0x475   : > { %v881_v27 = vpop.xlane.xlu0 %880 }
 0x476   : > { %1376 = vrcp.f32 %v881_v27 }
 0x477   : > { %v1365_v63 = vpop.eup %1364  ;;  %1378 = vrcp.f32 %v872_v5 }
 0x478   : > { %v1367_v29 = vpop.eup %1366  ;;  %v947_v56 = vmul.f32 %v1365_v63, %v1824_v51  ;;  %v946_v30 = vmul.f32 %v1365_v63, %v1820_v49 }
 0x479   : > { %v875_v11 = vpop.xlane.xlu0 %874  ;;  %v866_v31 = vpop.xlane.xlu1 %865  ;;  %v941_v35 = vmul.f32 %v1367_v29, %v1804_v36  ;;  %v940_v7 = vmul.f32 %v1367_v29, %v1800_v34 }
 0x47a   : > { %1380 = vrcp.f32 %v875_v11  ;;  %v963_v57 = vpack.c.bf16 %v947_v56, %v945_v6  ;;  %v962_v58 = vpack.c.bf16 %v946_v30, %v944_v17 }
 0x47b   : > { %v1369_v12 = vpop.eup %1368  ;;  %1382 = vrcp.f32 %v866_v31 }
 0x47c   : > { %978 = vmatprep.subr.bf16.mxu1 %v963_v57  ;;  %v943_v32 = vmul.f32 %v1369_v12, %v1832_v20  ;;  %v942_v51 = vmul.f32 %v1369_v12, %v1827_v13  ;;  %v1371_v37 = vpop.eup %1370  ;;  %v1297_v12 = vld [vmem:[%s1696_s12] ss:$8 sps:$4 sm:$0xff]  }
 0x47d   : > { %v869_v25 = vpop.xlane.xlu0 %868  ;;  %979 = vmatpush1.bf16.msra.mxu1 %v962_v58  ;;  %v937_v2 = vmul.f32 %v1371_v37, %v1812_v43  ;;  %v936_v46 = vmul.f32 %v1371_v37, %v1808_v40  ;;  %v971_v37 = vld [vmem:[%s1676_s9 + $0x18] sm:$0xff] }
 0x47e   : > { %1384 = vrcp.f32 %v869_v25  ;;  %v961_v49 = vpack.c.bf16 %v943_v32, %v941_v35  ;;  %v960_v8 = vpack.c.bf16 %v942_v51, %v940_v7  ;;  %v969_v35 = vld [vmem:[%s1676_s9 + $0x8] sm:$0xff]  ;;  %v970_v51 = vld [vmem:[%s1676_s9 + $0x10] sm:$0xff] }
 0x47f   : > { %v1373_v54 = vpop.eup %1372 }
 0x480   : > { %980 = vmatprep.subr.bf16.mxu1 %v961_v49  ;;  %v939_v36 = vmul.f32 %v1373_v54, %v1844_v0  ;;  %v938_v20 = vmul.f32 %v1373_v54, %v1839_v24  ;;  %v1375_v52 = vpop.eup %1374 }
 0x481   : > { %v863_v34 = vpop.xlane.xlu0 %862  ;;  %981 = vmatpush1.bf16.msra.mxu1 %v960_v8  ;;  %v860_v13 = vpop.xlane.xlu1 %859  ;;  %v933_v21 = vmul.f32 %v1375_v52, %v1816_v3  ;;  %v932_v0 = vmul.f32 %v1375_v52, %v1814_v45 }
 0x482   : > { %1386 = vrcp.f32 %v863_v34  ;;  %v959_v15 = vpack.c.bf16 %v939_v36, %v937_v2  ;;  %v958_v61 = vpack.c.bf16 %v938_v20, %v936_v46 }
 0x483   : > { %v1377_v62 = vpop.eup %1376  ;;  %1388 = vrcp.f32 %v860_v13 }
 0x484   : > { %982 = vmatprep.subr.bf16.mxu1 %v959_v15  ;;  %v935_v43 = vmul.f32 %v1377_v62, %v1858_v33  ;;  %v934_v40 = vmul.f32 %v1377_v62, %v1852_v28  ;;  %v1379_v59 = vpop.eup %1378 }
 0x485   : > { %v857_v24 = vpop.xlane.xlu0 %856  ;;  %983 = vmatpush1.bf16.msra.mxu1 %v958_v61  ;;  %v854_v9 = vpop.xlane.xlu1 %853  ;;  %v929_v23 = vmul.f32 %v1379_v59, %v1850_v16  ;;  %v928_v33 = vmul.f32 %v1379_v59, %v1848_v55 }
 0x486   : > { %1390 = vrcp.f32 %v857_v24  ;;  %v957_v60 = vpack.c.bf16 %v935_v43, %v933_v21  ;;  %v956_v22 = vpack.c.bf16 %v934_v40, %v932_v0 }
 0x487   : > { %v1381_v10 = vpop.eup %1380  ;;  %1392 = vrcp.f32 %v854_v9 }
 0x488   : > { %984 = vmatprep.subr.bf16.mxu1 %v957_v60  ;;  %v931_v3 = vmul.f32 %v1381_v10, %v1866_v39  ;;  %v930_v45 = vmul.f32 %v1381_v10, %v1862_v38  ;;  %v1383_v26 = vpop.eup %1382 }
 0x489   : > { %985 = vmatpush1.bf16.msra.mxu1 %v956_v22  ;;  %v925_v63 = vmul.f32 %v1383_v26, %v1870_v53  ;;  %v924_v29 = vmul.f32 %v1383_v26, %v1868_v1 }
 0x48a   : > { %v955_v28 = vpack.c.bf16 %v931_v3, %v929_v23  ;;  %v954_v5 = vpack.c.bf16 %v930_v45, %v928_v33 }
 0x48b   : > { %v1385_v27 = vpop.eup %1384 }
 0x48c   : > { %986 = vmatprep.subr.bf16.mxu1 %v955_v28  ;;  %v927_v6 = vmul.f32 %v1385_v27, %v1878_v42  ;;  %v926_v16 = vmul.f32 %v1385_v27, %v1876_v41 }
 0x48d   : > { %987 = vmatpush1.bf16.msra.mxu1 %v954_v5 }
 0x48e   : > { %v953_v39 = vpack.c.bf16 %v927_v6, %v925_v63  ;;  %v952_v56 = vpack.c.bf16 %v926_v16, %v924_v29 }
 0x48f   : > { %v1387_v55 = vpop.eup %1386 }
 0x490   : > { %v1389_v17 = vpop.eup %1388  ;;  %988 = vmatprep.subr.bf16.mxu1 %v953_v39  ;;  %v923_v38 = vmul.f32 %v1387_v55, %v1884_v47  ;;  %v922_v30 = vmul.f32 %v1387_v55, %v1880_v44 }
 0x491   : > { %989 = vmatpush1.bf16.msra.mxu1 %v952_v56  ;;  %v921_v53 = vmul.f32 %v1389_v17, %v1888_v48  ;;  %v920_v42 = vmul.f32 %v1389_v17, %v1886_v4 }
 0x493   : > { %v1391_v11 = vpop.eup %1390  ;;  %v951_v1 = vpack.c.bf16 %v923_v38, %v921_v53  ;;  %v950_v41 = vpack.c.bf16 %v922_v30, %v920_v42 }
 0x494   : > { %v1393_v31 = vpop.eup %1392  ;;  %v919_v57 = vmul.f32 %v1391_v11, %v1896_v18  ;;  %v918_v58 = vmul.f32 %v1391_v11, %v1890_v50  ;;  %v968_v18 = vld [vmem:[%s1676_s9] sm:$0xff] }
 0x495   : > { %990 = vmatprep.subr.bf16.mxu1 %v951_v1  ;;  %v917_v44 = vmul.f32 %v1393_v31, %v1900_v19  ;;  %v916_v47 = vmul.f32 %v1393_v31, %v1898_v14 }
 0x496   : > { %991 = vmatpush1.bf16.msra.mxu1 %v950_v41 }
 0x497   : > { %v949_v4 = vpack.c.bf16 %v919_v57, %v917_v44  ;;  %v948_v48 = vpack.c.bf16 %v918_v58, %v916_v47 }
 0x499   : > { %992 = vmatprep.subr.bf16.mxu1 %v949_v4 }
 0x49a   : > { %993 = vmatpush1.bf16.msra.mxu1 %v948_v48 }
 0x49d   : > { %1011 = vmatmul.mubr.bf16.vlgmr.msra.gmra.mxu1 %v1297_v12 }
 0x55d   : > { %v1012_v50 = vpop.f32.mrf.mxu1 }
 0x55e   : > { %v1021_v32 = vadd.f32 %v1012_v50, %v968_v18 }
 0x55f   : > { %v1014_v7 = vpop.f32.mrf.mxu1 }
 0x560   : > { %1025 = vst [vmem:[%s1676_s9] sm:$0xff] %v1021_v32  ;;  %v1022_v19 = vadd.f32 %v1014_v7, %v969_v35 }
 0x561   : > { %v1016_v14 = vpop.f32.mrf.mxu1 }
 0x562   : > { %1026 = vst [vmem:[%s1676_s9 + $0x8] sm:$0xff] %v1022_v19  ;;  %v1023_v25 = vadd.f32 %v1016_v14, %v970_v51  ;;  %1032 = sbr.rel (%p1198_p9) target bundleno = 1518 (0x5ee), region = 56 }
 0x563   : > { %v1018_v49 = vpop.f32.mrf.mxu1 }
 0x564   : > { %1027 = vst [vmem:[%s1676_s9 + $0x10] sm:$0xff] %v1023_v25  ;;  %v1024_v8 = vadd.f32 %v1018_v49, %v971_v37 }
 0x566   : > { %1028 = vst [vmem:[%s1676_s9 + $0x18] sm:$0xff] %v1024_v8 }
 0x567   : > { %v1038_v54 = vld [vmem:[%s2027_s5] sm:$0xff]  ;;  %v1529_v2 = vmov 0   ;;  %v1039_v36 = vld [vmem:[%s2027_s5 + $0x8] sm:$0xff]  ;;  %v1034_v46 = vld [vmem:[%s1676_s9] sm:$0xff]  ;;  %v1054_v34 = vstv %s1033_s26 }
 0x568   : > { %1394 = vset.pattern.permute.xlu0 %v1529_v2 }
 0x569   : > { %1042 = vperm.xlu0 %1394, %v1038_v54   ;;  %v1035_v20 = vld [vmem:[%s1676_s9 + $0x8] sm:$0xff] }
 0x56b   : > { %v1036_v61 = vld [vmem:[%s1676_s9 + $0x10] sm:$0xff] }
 0x56d   : > { %1047 = vperm.xlu0 %1394, %v1039_v36   ;;  %v1037_v62 = vld [vmem:[%s1676_s9 + $0x18] sm:$0xff] }
 0x5e4   : > { %v1043_v52 = vpop.permute.xlu0 %1042 }
 0x5e5   : > { %v1050_v13 = vadd.f32 %v1043_v52, %v1034_v46  ;;  %v1051_v15 = vadd.f32 %v1043_v52, %v1035_v20 }
 0x5e7   : > { %v1055_v21 = vmul.f32 %v1054_v34, %v1050_v13  ;;  %v1056_v43 = vmul.f32 %v1054_v34, %v1051_v15 }
 0x5e8   : > { %v1048_v0 = vpop.permute.xlu0 %1047 }
 0x5e9   : > { %1059 = vst [vmem:[%s1676_s9] sm:$0xff] %v1055_v21  ;;  %1060 = vst [vmem:[%s1676_s9 + $0x8] sm:$0xff] %v1056_v43  ;;  %v1052_v40 = vadd.f32 %v1048_v0, %v1036_v61  ;;  %v1053_v59 = vadd.f32 %v1048_v0, %v1037_v62 }
 0x5eb   : > { %v1057_v24 = vmul.f32 %v1054_v34, %v1052_v40  ;;  %v1058_v9 = vmul.f32 %v1054_v34, %v1053_v59 }
 0x5ed   : > { %1061 = vst [vmem:[%s1676_s9 + $0x10] sm:$0xff] %v1057_v24  ;;  %1062 = vst [vmem:[%s1676_s9 + $0x18] sm:$0xff] %v1058_v9 }
 0x5ee PF: > { %s1207_s20 = sshll.u32 %s1507_s27, 9  ;;  %s1077_s19 = sshll.u32 %s1676_s9, 4  ;;  %s1969_s19 = int_to_ptr.vmem [resolvable:$true] %s1077_s19 }
 0x5ef   : > { %s1966_s16 = scalar_lea.hbm %s2028_s6, %s1207_s20  ;;  %s1064_s21 = scalar_lea.sflag [#allocation8], %s1668_s8 }
 0x5f0   : > { %s1423_s0 = scalar_lea.vmem %s1969_s19, 512  ;;  %s1530_s12 = smov [#allocation9]  }
 0x5f1   : > { %p1424_p1 = scmp.ne.s32.totalorder %s1969_s19, %s1423_s0  ;;  %s1427_s22 = sshll.u32 %s1530_s12, 4  ;;  %s1428_s22 = int_to_ptr.vmem [resolvable:$false] %s1427_s22 }
 0x5f2   : > { %s1429_s27 = scalar_lea.vmem %s1428_s22, 1024  ;;  %p1430_p6 = scmp.lt.s32.totalorder %s1969_s19, %s1428_s22 }
 0x5f3   : > { %p1425_p4 = pnand %p1424_p1, %p1634_p10  ;;  %p1431_p7 = scmp.lt.s32.totalorder %s1429_s27, %s1423_s0 }
 0x5f5   : > { %p1426_p5 = pneg %p1425_p4  ;;  %p1432_p8 = por %p1431_p7, %p1430_p6 }
 0x5f7   : > { %p1433_p12 = pnand %p1432_p8, %p1426_p5 }
 0x5f9   : > { %1436 = shalt.err (!%p1433_p12)
}
 0x5fa   : > { %s1437_s9 = scalar_lea.hbm %s1966_s16, 512  ;;  %s1441_s10 = scalar_lea.hbm %s2028_s6, 1024 }
 0x5fb   : > { %p1438_p3 = scmp.ne.s32.totalorder %s1966_s16, %s1437_s9  ;;  %p1442_p0 = scmp.lt.s32.totalorder %s1966_s16, %s2028_s6 }
 0x5fc   : > { %p1443_p9 = scmp.lt.s32.totalorder %s1441_s10, %s1437_s9 }
 0x5fd   : > { %p1439_p13 = pnand %p1438_p3, %p1634_p10 }
 0x5fe   : > { %p1444_p1 = por %p1443_p9, %p1442_p0 }
 0x5ff   : > { %p1440_p2 = pneg %p1439_p13 }
 0x601   : > { %p1445_p4 = pnand %p1444_p1, %p1440_p2 }
 0x603   : > { %1448 = shalt.err (!%p1445_p4)
}
 0x604   : > { %s1531_s18 = smov 256   ;;  %s1532_s11 = smov 16  }
 0x605   : > { %1210 = dma.vmem_to_hbm [thread:$0]  (%p1634_p10), %s1969_s19, 512, %s1966_s16, %s1064_s21, %s1531_s18, %s1531_s18, %s1532_s11  }
 0x606 PF: > { %p1221_p5 = scmp.ge.s32.totalorder %s1519_s30, 2  ;;  %s1092_s0 = sand.u32 1, %s1491_s23  }
 0x607   : > { %s1093_s12 = scalar_lea.sflag [#allocation8], %s1092_s0 }
 0x608   : > { %p1217_p6 = pnand %p1221_p5, %p1640_p11 }
 0x60a   : > { %p1218_p7 = pneg %p1217_p6 }
 0x60c   : > { %1486 = dma.done.wait (%p1218_p7), %s1093_s12, 512  }
 0x60d   : > { %1488 = vsyncadd (%p1218_p7), %s1093_s12, 4294966784  ;;  %s23_s30 = sadd.s32 1, %s1519_s30   ;;  %s2037_s13 = sld [smem:[#allocation12_spill]] }
 0x60e   : > { %p20_p8 = scmp.ge.s32.totalorder %s23_s30, 6   ;;  %s2038_s8 = sld [smem:[#allocation13_spill]] }
 0x60f   : > { %s2039_s23 = smov %s1495_s24  ;;  %s2040_s24 = smov %s1499_s25 }
 0x610   : > { %s2041_s25 = smov %s1647_s17  ;;  %s2042_s26 = smov %s1511_s28 }
 0x611   : > { %s2043_s27 = smov %s1515_s29  ;;  %22 = sbr.rel (!%p20_p8) target bundleno = 9 (0x9), region = 99 }
 0x613   : > { %s2044_s28 = smov %s2037_s13 }
 0x614   : > { %s2045_s29 = smov %s2038_s8 }
 0x616   :  { %1098 = vsyncpa [#allocation7], 1 }
 0x617   :  { %1100 = vsyncpa [#allocation7 + $0x1], 1 }
 0x618   :  { %1101 = vsyncpa [#allocation8], 1 }
 0x619   :  { %1103 = vsyncpa [#allocation8 + $0x1], 1 }

</bundles_post_ra>
